<compile_context>
chip_gen: v7x
topology: tpu7x:2x2x1
jax: 0.10.0
libtpu: 0.0.40
codegen_flags: <defaults>
</compile_context>

<pallas_src>
import functools

import jax
import jax.numpy as jnp
from jax import lax
from jax.experimental import pallas as pl
from jax.experimental.pallas import tpu as pltpu

GAMMA = 2.0  # module default


def _round_up(x, m):
    return ((x + m - 1) // m) * m


def _focal_loss_kernel(preds_ref, tgt_ref, out_ref, *, gamma):
    # preds_ref: (TILE_N, Cp) native dtype ; tgt_ref: (TILE_N, 1) int32
    # out_ref:   (8, 128) f32 resident partial-sum block (same block for all steps).
    i = pl.program_id(0)

    @pl.when(i == 0)
    def _():
        out_ref[...] = jnp.zeros_like(out_ref)

    x = preds_ref[...].astype(jnp.float32)                      # (TILE_N, Cp)
    t = tgt_ref[...]                                            # (TILE_N, 1) int32

    # numerically-stable logsumexp over (padded) classes
    m = jnp.max(x, axis=-1, keepdims=True)                      # (TILE_N, 1)
    e = jnp.exp(x - m)
    lse = m + jnp.log(jnp.sum(e, axis=-1, keepdims=True))       # (TILE_N, 1)

    # gather target logit via masked sum (no dynamic gather / no f32 one-hot temp)
    col = lax.broadcasted_iota(jnp.int32, x.shape, 1)
    tgt_logit = jnp.sum(jnp.where(col == t, x, 0.0), axis=-1, keepdims=True)

    ce = jnp.maximum(lse - tgt_logit, 0.0)                      # clamp: pt <= 1, no NaN
    pt = jnp.exp(-ce)
    w = 1.0 - pt
    if gamma == 2:                                              # default: explicit square
        focal = w * w * ce
    else:
        focal = jnp.power(jnp.maximum(w, 0.0), gamma) * ce

    # Padded rows were built so focal == 0 exactly; no row mask needed here.
    out_ref[...] += jnp.sum(focal)   # broadcast scalar into the resident block


def focal_loss(preds, targets, *, alpha=None, gamma=GAMMA, reduction="mean"):
    """Pallas implementation of Focal_Loss.forward."""
    preds = jnp.asarray(preds)
    targets = jnp.asarray(targets)

    # PyTorch: if targets.dtype != torch.long -> return 0.0 (soft labels / Mixup)
    if not jnp.issubdtype(targets.dtype, jnp.integer):
        return jnp.float32(0.0)
    # TODO(synk): alpha (per-class weights) not implemented; module default is alpha=None.
    assert alpha is None

    n, c = preds.shape
    cp = _round_up(max(c, 128), 128)                 # lane-dense class dim

    # Tile sizing: ~2 MiB per (TILE_N, Cp) f32 full-tile temp.  With the
    # double-buffered (native-dtype) input block plus a handful of live f32
    # temps this stays well inside a 32 MiB scoped-VMEM limit on all of
    # v5e / v6e / v7x while giving 1-2+ MiB of HBM traffic per grid step.
    temp_budget = 2 * 1024 * 1024
    tile_n = temp_budget // (cp * 4)
    tile_n = max(8, min(4096, (tile_n // 8) * 8))
    tile_n = min(tile_n, _round_up(n, 8))            # don't over-pad tiny batches
    # TODO(synk): vocab-scale C (>~64K classes) would need a class-dim grid axis
    #   with an online logsumexp to stay inside v5e/v7x VMEM; not needed for a
    #   classification-head focal loss.

    n_tiles = pl.cdiv(n, tile_n)
    np_rows = n_tiles * tile_n                       # padded batch

    pad_val = float(jnp.finfo(preds.dtype).min)      # padded classes never win max/exp
    preds_p = preds
    if cp > c:
        preds_p = jnp.pad(preds_p, ((0, 0), (0, cp - c)), constant_values=pad_val)
    if np_rows > n:
        # Pad rows contribute *exactly* zero loss:
        #   row = [0, -big, ..., -big], target = 0  =>  ce = 0, pt = 1, focal = 0.
        pad_rows = jnp.full((np_rows - n, cp), pad_val, dtype=preds_p.dtype)
        pad_rows = pad_rows.at[:, 0].set(0)
        preds_p = jnp.concatenate([preds_p, pad_rows], axis=0)

    tgt_p = targets.astype(jnp.int32).reshape(n, 1)
    if np_rows > n:
        tgt_p = jnp.pad(tgt_p, ((0, np_rows - n), (0, 0)), constant_values=0)

    kernel = functools.partial(_focal_loss_kernel, gamma=gamma)

    cost = pl.CostEstimate(
        flops=10 * np_rows * cp,
        transcendentals=np_rows * cp + 2 * np_rows,
        bytes_accessed=np_rows * cp * preds_p.dtype.itemsize + np_rows * 4 + 8 * 128 * 4,
    )

    out = pl.pallas_call(
        kernel,
        out_shape=jax.ShapeDtypeStruct((8, 128), jnp.float32),
        grid_spec=pltpu.PrefetchScalarGridSpec(
            num_scalar_prefetch=0,
            grid=(n_tiles,),
            in_specs=[
                pl.BlockSpec((tile_n, cp), lambda i: (i, 0)),
                pl.BlockSpec((tile_n, 1), lambda i: (i, 0)),
            ],
            out_specs=pl.BlockSpec((8, 128), lambda i: (0, 0)),
        ),
        compiler_params=pltpu.CompilerParams(
            dimension_semantics=("arbitrary",),
            vmem_limit_bytes=32 * 1024 * 1024,
        ),
        cost_estimate=cost,
    )(preds_p, tgt_p)

    total = out[0, 0]                                # scalar was broadcast into the block
    if reduction == "mean":
        return total / jnp.float32(n)
    elif reduction == "sum":
        return total
    else:
        # TODO(synk): reduction='none' (per-sample vector output) not implemented.
        raise NotImplementedError("reduction='none' not supported by this kernel")


def _focal_loss_ref(preds, targets, gamma=GAMMA):
    # pure-JAX reference for sanity checking
    x = preds.astype(jnp.float32)
    lse = jax.scipy.special.logsumexp(x, axis=-1)
    tgt_logit = jnp.take_along_axis(x, targets[:, None].astype(jnp.int32), axis=-1)[:, 0]
    ce = lse - tgt_logit
    pt = jnp.exp(-ce)
    return jnp.mean((1.0 - pt) ** gamma * ce)


if __name__ == "__main__":
    key = jax.random.PRNGKey(0)
    k1, k2, k3, k4 = jax.random.split(key, 4)

    # Small classification-head shape: batch of 8 samples, 32 classes.
    N, C = 8, 32
    preds = jax.random.normal(k1, (N, C), dtype=jnp.float32)
    targets = jax.random.randint(k2, (N,), 0, C, dtype=jnp.int32)

    loss = jax.block_until_ready(focal_loss(preds, targets))
    ref = _focal_loss_ref(preds, targets)
    assert jnp.allclose(loss, ref, rtol=1e-5, atol=1e-5), (loss, ref)

    # Non-multiple batch / class counts exercise both row- and class-padding paths.
    N2, C2 = 300, 100
    preds2 = jax.random.normal(k3, (N2, C2), dtype=jnp.float32)
    targets2 = jax.random.randint(k4, (N2,), 0, C2, dtype=jnp.int32)
    loss2 = jax.block_until_ready(focal_loss(preds2, targets2))
    ref2 = _focal_loss_ref(preds2, targets2)
    assert jnp.allclose(loss2, ref2, rtol=1e-5, atol=1e-5), (loss2, ref2)

    # native-bf16 path: DMA ships bf16, upcast to f32 happens inside the kernel
    preds_bf = preds2.astype(jnp.bfloat16)
    loss_bf = jax.block_until_ready(focal_loss(preds_bf, targets2))
    ref_bf = _focal_loss_ref(preds_bf.astype(jnp.float32), targets2)
    assert jnp.allclose(loss_bf, ref_bf, rtol=1e-4, atol=1e-4), (loss_bf, ref_bf)

    # sum reduction path
    loss_sum = jax.block_until_ready(focal_loss(preds, targets, reduction="sum"))
    assert jnp.allclose(loss_sum, ref * N, rtol=1e-5, atol=1e-5), (loss_sum, ref * N)

    # soft-label (Mixup) path: non-integer targets -> 0.0, as in the module
    soft = focal_loss(preds, jax.nn.one_hot(targets, C))
    assert float(soft) == 0.0

    print("KERNEL_OK")
</pallas_src>

<mosaic_0001>
module attributes {stable_mosaic.version = 11 : i64} {
  func.func @_focal_loss_kernel(%arg0: i32, %arg1: memref<8x128xf32, #tpu.memory_space<vmem>>, %arg2: memref<8x1xi32, #tpu.memory_space<vmem>>, %arg3: memref<8x128xf32, #tpu.memory_space<vmem>>) attributes {dimension_semantics = [#tpu.dimension_semantics<arbitrary>], iteration_bounds = array<i64: 1>, scalar_prefetch = 0 : i64, scratch_operands = 0 : i64, tpu.core_type = #tpu.core_type<tc>, window_params = [{transform_indices = @transform_0, window_bounds = array<i64: 8, 128>}, {transform_indices = @transform_1, window_bounds = array<i64: 8, 1>}, {pipeline_mode = #tpu.pipeline_mode<synchronous>, transform_indices = @transform_2, window_bounds = array<i64: 8, 128>}]} {
    %c0_i32 = arith.constant 0 : i32
    %0 = arith.cmpi eq, %arg0, %c0_i32 : i32
    %1 = arith.extui %0 : i1 to i32
    %c0_i32_0 = arith.constant 0 : i32
    %2 = arith.cmpi ne, %1, %c0_i32_0 : i32
    scf.if %2 {
      %cst_15 = arith.constant 0.000000e+00 : f32
      %39 = vector.broadcast %cst_15 : f32 to vector<8x128xf32>
      %c0_16 = arith.constant 0 : index
      %c0_17 = arith.constant 0 : index
      %40 = vector.load %arg3[%c0_16, %c0_17] : memref<8x128xf32, #tpu.memory_space<vmem>>, vector<8x128xf32>
      tpu.vector_store %arg3[%c0_16, %c0_17], %39 {strides = array<i32>} : memref<8x128xf32, #tpu.memory_space<vmem>>, vector<8x128xf32>,
    } else {
    }
    %c0 = arith.constant 0 : index
    %c0_1 = arith.constant 0 : index
    %3 = vector.load %arg1[%c0, %c0_1] : memref<8x128xf32, #tpu.memory_space<vmem>>, vector<8x128xf32>
    %c0_2 = arith.constant 0 : index
    %c0_3 = arith.constant 0 : index
    %4 = vector.load %arg2[%c0_2, %c0_3] : memref<8x1xi32, #tpu.memory_space<vmem>>, vector<8x1xi32>
    %cst = arith.constant dense<0xFF800000> : vector<8xf32>
    %5 = vector.multi_reduction <maximumf>, %3, %cst [1] : vector<8x128xf32> to vector<8xf32>
    %6 = vector.shape_cast %5 : vector<8xf32> to vector<8x1xf32>
    %7 = vector.broadcast %6 : vector<8x1xf32> to vector<8x128xf32>
    %8 = arith.subf %3, %7 : vector<8x128xf32>
    %9 = math.exp %8 : vector<8x128xf32>
    %cst_4 = arith.constant dense<0.000000e+00> : vector<8xf32>
    %10 = vector.multi_reduction <add>, %9, %cst_4 [1] : vector<8x128xf32> to vector<8xf32>
    %11 = vector.shape_cast %10 : vector<8xf32> to vector<8x1xf32>
    %12 = math.log %11 : vector<8x1xf32>
    %13 = arith.addf %6, %12 : vector<8x1xf32>
    %14 = tpu.iota {dimensions = array<i32: 1>} : vector<8x128xi32>
    %15 = vector.broadcast %4 : vector<8x1xi32> to vector<8x128xi32>
    %16 = arith.cmpi eq, %14, %15 : vector<8x128xi32>
    %cst_5 = arith.constant 0.000000e+00 : f32
    %17 = vector.broadcast %cst_5 : f32 to vector<8x128xf32>
    %18 = arith.select %16, %3, %17 : vector<8x128xi1>, vector<8x128xf32>
    %cst_6 = arith.constant dense<0.000000e+00> : vector<8xf32>
    %19 = vector.multi_reduction <add>, %18, %cst_6 [1] : vector<8x128xf32> to vector<8xf32>
    %20 = vector.shape_cast %19 : vector<8xf32> to vector<8x1xf32>
    %21 = arith.subf %13, %20 : vector<8x1xf32>
    %cst_7 = arith.constant 0.000000e+00 : f32
    %22 = vector.broadcast %cst_7 : f32 to vector<8x1xf32>
    %23 = arith.maximumf %21, %22 : vector<8x1xf32>
    %cst_8 = arith.constant 0.000000e+00 : f32
    %24 = vector.broadcast %cst_8 : f32 to vector<8x1xf32>
    %25 = arith.subf %24, %23 : vector<8x1xf32>
    %26 = math.exp %25 : vector<8x1xf32>
    %cst_9 = arith.constant 1.000000e+00 : f32
    %27 = vector.broadcast %cst_9 : f32 to vector<8x1xf32>
    %28 = arith.subf %27, %26 : vector<8x1xf32>
    %29 = arith.mulf %28, %28 : vector<8x1xf32>
    %30 = arith.mulf %29, %23 : vector<8x1xf32>
    %c0_10 = arith.constant 0 : index
    %c0_11 = arith.constant 0 : index
    %31 = vector.load %arg3[%c0_10, %c0_11] : memref<8x128xf32, #tpu.memory_space<vmem>>, vector<8x128xf32>
    %32 = vector.shape_cast %30 : vector<8x1xf32> to vector<1x8x1xf32>
    %cst_12 = arith.constant dense<0.000000e+00> : vector<1xf32>
    %33 = vector.multi_reduction <add>, %32, %cst_12 [1, 2] : vector<1x8x1xf32> to vector<1xf32>
    %34 = vector.shape_cast %33 : vector<1xf32> to vector<1x1x1xf32>
    %35 = vector.extract %34[0, 0, 0] : f32 from vector<1x1x1xf32>
    %36 = vector.broadcast %35 : f32 to vector<8x128xf32>
    %37 = arith.addf %31, %36 : vector<8x128xf32>
    %c0_13 = arith.constant 0 : index
    %c0_14 = arith.constant 0 : index
    %38 = vector.load %arg3[%c0_13, %c0_14] : memref<8x128xf32, #tpu.memory_space<vmem>>, vector<8x128xf32>
    tpu.vector_store %arg3[%c0_13, %c0_14], %37 {strides = array<i32>} : memref<8x128xf32, #tpu.memory_space<vmem>>, vector<8x128xf32>,
    return
  }
  func.func @transform_0(%arg0: i32) -> (i32, i32) {
    %c0_i32 = arith.constant 0 : i32
    %c0_i32_0 = arith.constant 0 : i32
    return %arg0, %c0_i32 : i32, i32
  }
  func.func @transform_1(%arg0: i32) -> (i32, i32) {
    %c0_i32 = arith.constant 0 : i32
    %c0_i32_0 = arith.constant 0 : i32
    return %arg0, %c0_i32 : i32, i32
  }
  func.func @transform_2(%arg0: i32) -> (i32, i32) {
    %c0_i32 = arith.constant 0 : i32
    %c0_i32_0 = arith.constant 0 : i32
    %c0_i32_1 = arith.constant 0 : i32
    return %c0_i32, %c0_i32_0 : i32, i32
  }
}

</mosaic_0001>

<bundles_post_ra>
// kernel: tpu_custom_call.1
= control target key start
LH: loop header
LB: loop body
LE: loop exit
PB: predicated region body
PF: predicated region fallthrough
CT: control target
= control target key end

     0   :  { %s146_s0 = inlined_call_operand.vmem [shape: f32[8,128], index: 0, kind: input, shape index: {}]   ;;  %s147_s1 = inlined_call_operand.vmem [shape: s32[8,1], index: 1, kind: input, shape index: {}]   ;;  %s148_s2 = inlined_call_operand.hbm [shape: f32[8,128], index: 2, kind: output, shape index: {}]  }
   0x1   :  { %v17_v0 = vld [vmem:[%s146_s0] sm:$0xff] }
   0x2   :  { %7 = vsyncpa [#allocation3], 0  ;;  %19 = vmax.xlane.f32.xlu0 %v17_v0  ;;  %v111_v1 = vmov 0   ;;  %v18_v2 = vld [vmem:[%s147_s1] sm:$0xff]  ;;  %v29_v6 = vlaneseq  ;;  %vm47_vm1 = vcmask 7168   ;;  %s112_s0 = smov [#allocation2]  }
   0x3   :  { %80 = vset.pattern.permute.xlu0 %v111_v1  ;;  %s67_s1 = sshll.u32 %s112_s0, 4  ;;  %s68_s1 = int_to_ptr.vmem [resolvable:$true] %s67_s1 }
   0x4   :  { %v30_v7 = vand.u32 127, %v29_v6  ;;  %s87_s14 = scalar_lea.vmem %s68_s1, 128  ;;  %p92_p1 = scmp.lt.s32.totalorder %s68_s1, %s68_s1 }
   0x5   :  { %p88_p0 = scmp.ne.s32.totalorder %s68_s1, %s87_s14  ;;  %p93_p2 = scmp.lt.s32.totalorder %s87_s14, %s87_s14 }
   0x7   :  { %p94_p3 = por %p93_p2, %p92_p1 }
   0x9   :  { %p95_p4 = pnand %p94_p3, %p88_p0 }
  0x18   :  { %32 = vperm.xlu0 %80, %v18_v2  }
  0x8f   :  { %v20_v3 = vpop.xlane.xlu0 %19 }
  0x90   :  { %v21_v4 = vsub.f32 %v17_v0, %v20_v3 }
  0x92   :  { %v22_v5 = vmul.f32 1.442695, %v21_v4 }
  0x94   :  { %81 = vpow2.f32 %v22_v5 }
  0x97   :  { %v33_v8 = vpop.permute.xlu0 %32 }
  0x98   :  { %vm34_vm0 = vcmp.eq.s32.totalorder %v30_v7, %v33_v8 }
  0x99   :  { %v35_v10 = vsel %vm34_vm0, %v17_v0, 0.0 }
  0x9e   :  { %v82_v9 = vpop.eup %81 }
  0x9f   :  { %24 = vadd.xlane.f32.xlu1 %v82_v9 }
  0xa3   :  { %36 = vadd.xlane.f32.xlu1 %v35_v10 }
 0x12c   :  { %v25_v11 = vpop.xlane.xlu1 %24 }
 0x12d   :  { %83 = vlog2.f32 %v25_v11 }
 0x130   :  { %v37_v14 = vpop.xlane.xlu1 %36 }
 0x137   :  { %v84_v12 = vpop.eup %83 }
 0x138   :  { %v27_v13 = vmul.f32 0.6931472, %v84_v12 }
 0x13a   :  { %v28_v15 = vadd.f32 %v27_v13, %v20_v3 }
 0x13c   :  { %v38_v16 = vsub.f32 %v28_v15, %v37_v14 }
 0x13e   :  { %v39_v17 = vmax.f32 %v38_v16, 0.0 }
 0x140   :  { %v40_v18 = vsub.f32 0.0, %v39_v17 }
 0x142   :  { %v41_v19 = vmul.f32 1.442695, %v40_v18 }
 0x144   :  { %85 = vpow2.f32 %v41_v19 }
 0x14e   :  { %v86_v20 = vpop.eup %85 }
 0x14f   :  { %v43_v21 = vsub.f32 1.0, %v86_v20 }
 0x151   :  { %v44_v22 = vmul.f32 %v43_v21, %v43_v21 }
 0x153   :  { %v45_v23 = vmul.f32 %v44_v22, %v39_v17 }
 0x155   :  { %v48_v24 = vsel %vm47_vm1, %v45_v23, 0.0 }
 0x156   :  { %49 = vadd.xlane.f32.xlu1 %v48_v24 }
 0x1e3   :  { %v50_v25 = vpop.xlane.xlu1 %49 }
 0x1e4   :  { %v51_v26 = vrot.slane %v50_v25, 4 }
 0x1e6   :  { %v52_v27 = vadd.f32 %v51_v26, %v50_v25 }
 0x1e8   :  { %v53_v28 = vrot.slane %v52_v27, 2 }
 0x1ea   :  { %v54_v29 = vadd.f32 %v53_v28, %v52_v27 }
 0x1ec   :  { %v55_v30 = vrot.slane %v54_v29, 1 }
 0x1ee   :  { %v56_v31 = vadd.f32 %v55_v30, %v54_v29 }
 0x1f0   :  { %75 = vpush %v56_v31 }
 0x221   :  { %s76_s13 = spop %75 }
 0x222   :  { %v58_v32 = vstv %s76_s13 }
 0x223   :  { %60 = vst [vmem:[#allocation2] sm:$0xff] %v58_v32 }
 0x224   :  { %98 = shalt.err (!%p95_p4)
}
 0x225   :  { %s99_s17 = scalar_lea.hbm %s148_s2, 128 }
 0x226   :  { %p100_p5 = scmp.ne.s32.totalorder %s148_s2, %s99_s17  ;;  %p103_p6 = scmp.lt.u32.totalorder %s99_s17, %s148_s2 }
 0x228   :  { %p105_p7 = pnand %p103_p6, %p100_p5 }
 0x22a   :  { %108 = shalt.err (!%p105_p7)
}
 0x22b   :  { %70 = dma.vmem_to_hbm [thread:$0]  %s68_s1, 128, %s148_s2, [#allocation3]  }
 0x22c   :  { %109 = dma.done.wait [#allocation3], 128  }
 0x22d   :  { %110 = vsyncadd [#allocation3], 4294967168 }
 0x22e   :  { %74 = vsyncpa [#allocation3], 1 }

</bundles_post_ra>
